<compile_context>
chip_gen: v7x
topology: tpu7x:2x2x1
jax: 0.10.0
libtpu: 0.0.40
codegen_flags: <defaults>
</compile_context>

<pallas_src>
import functools
import math

import jax
import jax.numpy as jnp
from jax.experimental import pallas as pl
from jax.experimental.pallas import tpu as pltpu

NUM_GROUPS = 32
GN_EPS = 1e-5
VMEM_LIMIT = 48 * 1024 * 1024          # safe on v7x (64 MiB phys) and below
KV_RESIDENT_BUDGET = 24 * 1024 * 1024  # K+V, double-buffered, per batch


# --------------------------------------------------------------------------
# Kernel 1: GroupNorm statistics -> per-(batch, channel) affine scale/shift
# --------------------------------------------------------------------------
def _gn_affine_kernel(x_ref, g_ref, gamma_ref, beta_ref,
                      scale_ref, shift_ref, s1_sc, s2_sc, *, hw_total, lane_w):
    t = pl.program_id(1)

    @pl.when(t == 0)
    def _():
        s1_sc[...] = jnp.zeros(s1_sc.shape, jnp.float32)
        s2_sc[...] = jnp.zeros(s2_sc.shape, jnp.float32)

    ts = x_ref.shape[2]
    nchunks = ts // lane_w
    # Lane-wide accumulation: pure VPU adds on (C, lane_w) chunks, no
    # per-step cross-lane reduction and no lane-width-1 scratch stores.
    s1 = s1_sc[...]
    s2 = s2_sc[...]
    for i in range(nchunks):
        xc = x_ref[0, :, i * lane_w:(i + 1) * lane_w]       # (C, lane_w)
        s1 = s1 + xc
        s2 = s2 + xc * xc
    s1_sc[...] = s1
    s2_sc[...] = s2

    @pl.when(t == pl.num_programs(1) - 1)
    def _():
        c = g_ref.shape[0]
        inv_n = 1.0 / float(hw_total * (c // NUM_GROUPS))
        # One wide group matmul per batch: G @ [s1_lane | s2_lane], then a
        # single cross-lane reduce per half (matmul commutes with lane sum).
        s12 = jnp.concatenate([s1_sc[...], s2_sc[...]], axis=1)     # (C, 2*lane_w)
        g = jnp.dot(g_ref[...], s12, preferred_element_type=jnp.float32)
        gsum1 = jnp.sum(g[:, :lane_w], axis=1, keepdims=True)       # (C, 1)
        gsum2 = jnp.sum(g[:, lane_w:], axis=1, keepdims=True)       # (C, 1)
        mean = gsum1 * inv_n
        var = gsum2 * inv_n - mean * mean
        inv = jax.lax.rsqrt(var + GN_EPS)
        scale = inv * gamma_ref[...]                                # (C, 1)
        scale_ref[0] = scale
        shift_ref[0] = beta_ref[...] - mean * scale


# --------------------------------------------------------------------------
# Kernel 2: fused K/V projection (stacked (2C, C) weight), channel-major,
#           stored in the compute dtype (bf16 halves HBM/VMEM traffic)
# --------------------------------------------------------------------------
def _kv_proj_kernel(x_ref, scale_ref, shift_ref, wkv_ref, bkv_ref, k_ref, v_ref):
    cd = wkv_ref.dtype
    c = k_ref.shape[1]
    xn = (x_ref[0] * scale_ref[0] + shift_ref[0]).astype(cd)        # (C, tp) normalized
    kv = jnp.dot(wkv_ref[...], xn,
                 preferred_element_type=jnp.float32) + bkv_ref[...]  # (2C, tp)
    k_ref[0] = kv[:c].astype(k_ref.dtype)
    v_ref[0] = kv[c:].astype(v_ref.dtype)


# --------------------------------------------------------------------------
# Kernel 3: flash attention (online softmax) + out-projection + residual
# --------------------------------------------------------------------------
def _flash_attn_kernel(x_ref, scale_ref, shift_ref, k_ref, v_ref,
                       wq_ref, bq_ref, wo_ref, bo_ref, o_ref,
                       q_sc, m_sc, l_sc, acc_sc,
                       *, sm_scale, approx_recip, tk, kv_resident):
    ki = pl.program_id(2)
    cd = q_sc.dtype

    @pl.when(ki == 0)
    def _():
        # Normalize this query tile and project Q once; 1/sqrt(C) folded into q.
        xn = (x_ref[0] * scale_ref[0] + shift_ref[0]).astype(cd)    # (C, tq)
        q = jnp.dot(wq_ref[...], xn, preferred_element_type=jnp.float32)
        q = (q + bq_ref[...]) * sm_scale                            # (C, tq)
        q_sc[...] = jnp.transpose(q).astype(cd)                     # (tq, C) token-major
        m_sc[...] = jnp.full(m_sc.shape, -jnp.inf, jnp.float32)
        l_sc[...] = jnp.zeros(l_sc.shape, jnp.float32)
        acc_sc[...] = jnp.zeros(acc_sc.shape, jnp.float32)

    if kv_resident:
        # K/V block is the whole (C, HW) slab, resident per batch; slice the
        # current kv tile from VMEM (no HBM re-stream per q-tile).
        start = pl.multiple_of(ki * tk, tk)
        k = k_ref[0, :, pl.ds(start, tk)]                           # (C, tk)
        v = v_ref[0, :, pl.ds(start, tk)]                           # (C, tk)
    else:
        k = k_ref[0]                                                # (C, tk)
        v = v_ref[0]                                                # (C, tk)

    # s[q, k] = sum_c q_tok[q, c] * k_cm[c, k]   (native contraction, no transpose)
    s = jax.lax.dot_general(q_sc[...], k, (((1,), (0,)), ((), ())),
                            preferred_element_type=jnp.float32)     # (tq, tk)
    m_prev = m_sc[...]
    m_new = jnp.maximum(m_prev, jnp.max(s, axis=-1, keepdims=True)) # (tq, 1)
    alpha = jnp.exp(m_prev - m_new)
    p = jnp.exp(s - m_new)
    l_sc[...] = alpha * l_sc[...] + jnp.sum(p, axis=-1, keepdims=True)
    # acc[q, c] += sum_k p[q, k] * v_cm[c, k]    (contract last dims, no v transpose)
    pv = jax.lax.dot_general(p.astype(cd), v, (((1,), (1,)), ((), ())),
                             preferred_element_type=jnp.float32)    # (tq, C)
    acc_sc[...] = alpha * acc_sc[...] + pv
    m_sc[...] = m_new

    @pl.when(ki == pl.num_programs(2) - 1)
    def _():
        # Deferred softmax normalization on the (tq, C) accumulator only.
        inv_l = pl.reciprocal(l_sc[...], approx=approx_recip)       # (tq, 1)
        o_cm = jnp.transpose(acc_sc[...] * inv_l).astype(cd)        # (C, tq)
        y = jnp.dot(wo_ref[...], o_cm, preferred_element_type=jnp.float32) + bo_ref[...]
        o_ref[0] = (y + x_ref[0]).astype(o_ref.dtype)               # residual, NCHW layout


# --------------------------------------------------------------------------
# Wrapper
# --------------------------------------------------------------------------
def _pick_tile(n, target):
    """Largest divisor of n that is <= target and a multiple of 8; else n (full)."""
    t = min(n, target)
    while t >= 8:
        if n % t == 0 and t % 8 == 0:
            return t
        t -= 1
    return n


def vae_attention_block(x_nchw, params, *, compute_dtype=jnp.bfloat16,
                        tile_stats=2048, tile_proj=1024, tile_q=512, tile_k=512):
    """x_nchw: (B, C, H, W) float32 -> (B, C, H, W) float32."""
    B, C, H, W = x_nchw.shape
    assert C % NUM_GROUPS == 0
    HW = H * W
    x3 = x_nchw.reshape(B, C, HW)          # channel-major tokens; no transpose

    gamma, beta, wq, wk, wv, wo, bq, bk, bv, bo = params

    ts = _pick_tile(HW, tile_stats)        # stats kernel (memory-bound -> biggest)
    tp = _pick_tile(HW, tile_proj)         # K/V projection kernel
    tq = _pick_tile(HW, tile_q)
    tk = _pick_tile(HW, tile_k)
    lane_w = 128 if ts % 128 == 0 else ts

    # Constant group-indicator matrix (computed once in the wrapper).
    grp = jnp.arange(C, dtype=jnp.int32) // (C // NUM_GROUPS)
    G = (grp[:, None] == grp[None, :]).astype(jnp.float32)

    # ---- kernel 1: GroupNorm stats -> affine (scale, shift) per (B, C) ----
    aff_shape = jax.ShapeDtypeStruct((B, C, 1), jnp.float32)
    gn_scale, gn_shift = pl.pallas_call(
        functools.partial(_gn_affine_kernel, hw_total=HW, lane_w=lane_w),
        out_shape=(aff_shape, aff_shape),
        grid_spec=pltpu.PrefetchScalarGridSpec(
            num_scalar_prefetch=0,
            grid=(B, HW // ts),
            in_specs=[
                pl.BlockSpec((1, C, ts), lambda b, t: (b, 0, t)),
                pl.BlockSpec((C, C), lambda b, t: (0, 0)),
                pl.BlockSpec((C, 1), lambda b, t: (0, 0)),
                pl.BlockSpec((C, 1), lambda b, t: (0, 0)),
            ],
            out_specs=(pl.BlockSpec((1, C, 1), lambda b, t: (b, 0, 0)),
                       pl.BlockSpec((1, C, 1), lambda b, t: (b, 0, 0))),
            scratch_shapes=[pltpu.VMEM((C, lane_w), jnp.float32),
                            pltpu.VMEM((C, lane_w), jnp.float32)],
        ),
        compiler_params=pltpu.CompilerParams(
            dimension_semantics=("parallel", "arbitrary"),
            vmem_limit_bytes=VMEM_LIMIT),
    )(x3, G, gamma, beta)

    # Weights in the compute dtype (bf16 default: bf16 MXU operands, f32 accumulate).
    wq_c, wo_c = (w.astype(compute_dtype) for w in (wq, wo))
    wkv_c = jnp.concatenate([wk, wv], axis=0).astype(compute_dtype)   # (2C, C)
    bkv = jnp.concatenate([bk, bv], axis=0)                           # (2C, 1) f32

    # ---- kernel 2: fused K/V projection, channel-major, compute dtype ----
    kv_shape = jax.ShapeDtypeStruct((B, C, HW), compute_dtype)
    k_all, v_all = pl.pallas_call(
        _kv_proj_kernel,
        out_shape=(kv_shape, kv_shape),
        grid_spec=pltpu.PrefetchScalarGridSpec(
            num_scalar_prefetch=0,
            grid=(B, HW // tp),
            in_specs=[
                pl.BlockSpec((1, C, tp), lambda b, t: (b, 0, t)),
                pl.BlockSpec((1, C, 1), lambda b, t: (b, 0, 0)),
                pl.BlockSpec((1, C, 1), lambda b, t: (b, 0, 0)),
                pl.BlockSpec((2 * C, C), lambda b, t: (0, 0)),
                pl.BlockSpec((2 * C, 1), lambda b, t: (0, 0)),
            ],
            out_specs=(pl.BlockSpec((1, C, tp), lambda b, t: (b, 0, t)),
                       pl.BlockSpec((1, C, tp), lambda b, t: (b, 0, t))),
        ),
        compiler_params=pltpu.CompilerParams(
            dimension_semantics=("parallel", "parallel"),
            vmem_limit_bytes=VMEM_LIMIT),
    )(x3, gn_scale, gn_shift, wkv_c, bkv)

    # ---- kernel 3: flash attention + out-proj + residual (writes NCHW) ----
    csize = jnp.dtype(compute_dtype).itemsize
    # Resident K/V (block index depends only on b): double-buffered footprint.
    kv_resident = (2 * 2 * C * HW * csize) <= KV_RESIDENT_BUDGET
    if kv_resident:
        # NOTE: on v7x (64 MiB VMEM) these could additionally use
        # pipeline_mode=pl.Buffered(1) since the block only changes with b.
        k_spec = pl.BlockSpec((1, C, HW), lambda b, qi, ki: (b, 0, 0))
        v_spec = pl.BlockSpec((1, C, HW), lambda b, qi, ki: (b, 0, 0))
    else:
        k_spec = pl.BlockSpec((1, C, tk), lambda b, qi, ki: (b, 0, ki))
        v_spec = pl.BlockSpec((1, C, tk), lambda b, qi, ki: (b, 0, ki))

    out = pl.pallas_call(
        functools.partial(_flash_attn_kernel,
                          sm_scale=1.0 / math.sqrt(C),
                          approx_recip=(compute_dtype != jnp.float32),
                          tk=tk, kv_resident=kv_resident),
        out_shape=jax.ShapeDtypeStruct((B, C, HW), jnp.float32),
        grid_spec=pltpu.PrefetchScalarGridSpec(
            num_scalar_prefetch=0,
            grid=(B, HW // tq, HW // tk),
            in_specs=[
                pl.BlockSpec((1, C, tq), lambda b, qi, ki: (b, 0, qi)),   # x (Q src + residual)
                pl.BlockSpec((1, C, 1), lambda b, qi, ki: (b, 0, 0)),     # GN scale
                pl.BlockSpec((1, C, 1), lambda b, qi, ki: (b, 0, 0)),     # GN shift
                k_spec,                                                    # K (resident or tile)
                v_spec,                                                    # V (resident or tile)
                pl.BlockSpec((C, C), lambda b, qi, ki: (0, 0)),           # Wq
                pl.BlockSpec((C, 1), lambda b, qi, ki: (0, 0)),           # bq
                pl.BlockSpec((C, C), lambda b, qi, ki: (0, 0)),           # Wo
                pl.BlockSpec((C, 1), lambda b, qi, ki: (0, 0)),           # bo
            ],
            out_specs=pl.BlockSpec((1, C, tq), lambda b, qi, ki: (b, 0, qi)),
            scratch_shapes=[
                pltpu.VMEM((tq, C), compute_dtype),   # Q tile (token-major)
                pltpu.VMEM((tq, 1), jnp.float32),     # running max
                pltpu.VMEM((tq, 1), jnp.float32),     # running denom
                pltpu.VMEM((tq, C), jnp.float32),     # output accumulator
            ],
        ),
        compiler_params=pltpu.CompilerParams(
            dimension_semantics=("parallel", "parallel", "arbitrary"),
            vmem_limit_bytes=VMEM_LIMIT),
    )(x3, gn_scale, gn_shift, k_all, v_all, wq_c, bq, wo_c, bo)

    return out.reshape(B, C, H, W)


# --------------------------------------------------------------------------
# Parameters / pure-JAX reference
# --------------------------------------------------------------------------
def init_params(key, C):
    """Synthetic parameters in PyTorch layouts: weights (out, in), biases (C, 1)."""
    ks = jax.random.split(key, 6)
    gamma = (1.0 + 0.1 * jax.random.normal(ks[0], (C, 1))).astype(jnp.float32)
    beta = (0.1 * jax.random.normal(ks[1], (C, 1))).astype(jnp.float32)
    w_in = (0.05 * jax.random.normal(ks[2], (3 * C, C))).astype(jnp.float32)   # (out=3C, in=C)
    b_in = (0.05 * jax.random.normal(ks[3], (3 * C,))).astype(jnp.float32)
    w_out = (0.05 * jax.random.normal(ks[4], (C, C))).astype(jnp.float32)      # (out=C, in=C)
    b_out = (0.05 * jax.random.normal(ks[5], (C,))).astype(jnp.float32)

    wq, wk, wv = w_in[0:C], w_in[C:2 * C], w_in[2 * C:3 * C]   # torch (out, in) layout
    bq = b_in[0:C].reshape(C, 1)
    bk = b_in[C:2 * C].reshape(C, 1)
    bv = b_in[2 * C:3 * C].reshape(C, 1)
    wo = w_out
    bo = b_out.reshape(C, 1)
    return (gamma, beta, wq, wk, wv, wo, bq, bk, bv, bo)


def reference_jax(x_nchw, params):
    """Pure-JAX reference mirroring the PyTorch forward pass."""
    gamma, beta, wq, wk, wv, wo, bq, bk, bv, bo = params
    B, C, H, W = x_nchw.shape
    cs = C // NUM_GROUPS
    xg = x_nchw.reshape(B, NUM_GROUPS, cs, H, W)
    mean = jnp.mean(xg, axis=(2, 3, 4), keepdims=True)
    var = jnp.var(xg, axis=(2, 3, 4), keepdims=True)
    xn = ((xg - mean) / jnp.sqrt(var + GN_EPS)).reshape(B, C, H, W)
    xn = xn * gamma.reshape(1, C, 1, 1) + beta.reshape(1, C, 1, 1)

    t = jnp.transpose(xn.reshape(B, C, H * W), (0, 2, 1))      # (B, HW, C) tokens
    q = t @ wq.T + bq.reshape(1, 1, C)
    k = t @ wk.T + bk.reshape(1, 1, C)
    v = t @ wv.T + bv.reshape(1, 1, C)
    s = jnp.einsum("bqc,bkc->bqk", q, k) / math.sqrt(C)
    p = jax.nn.softmax(s, axis=-1)
    o = jnp.einsum("bqk,bkc->bqc", p, v)
    y = o @ wo.T + bo.reshape(1, 1, C)
    y = jnp.transpose(y, (0, 2, 1)).reshape(B, C, H, W)
    return y + x_nchw


if __name__ == "__main__":
    B, C, H, W = 2, 64, 8, 8   # C must be a multiple of 32 (GroupNorm groups)
    key = jax.random.PRNGKey(0)
    kx, kp = jax.random.split(key)
    x = jax.random.normal(kx, (B, C, H, W), dtype=jnp.float32)
    params = init_params(kp, C)

    ref = jax.block_until_ready(reference_jax(x, params))

    # Default path: bf16 MXU operands, f32 accumulation (looser tolerance).
    out_bf = jax.block_until_ready(vae_attention_block(x, params))
    assert out_bf.shape == (B, C, H, W)
    err_bf = float(jnp.max(jnp.abs(out_bf - ref)))
    assert jnp.allclose(out_bf, ref, atol=5e-2, rtol=5e-2), f"bf16 max abs err {err_bf}"

    # f32 validation path (tight tolerance; exact reciprocal).
    out_f32 = jax.block_until_ready(
        vae_attention_block(x, params, compute_dtype=jnp.float32))
    err_f32 = float(jnp.max(jnp.abs(out_f32 - ref)))
    assert jnp.allclose(out_f32, ref, atol=1e-4, rtol=1e-4), f"f32 max abs err {err_f32}"

    print("KERNEL_OK")
</pallas_src>

<mosaic_0001>
module attributes {stable_mosaic.version = 11 : i64} {
  func.func @_gn_affine_kernel(%arg0: i32, %arg1: i32, %arg2: memref<1x64x64xf32, #tpu.memory_space<vmem>>, %arg3: memref<64x64xf32, #tpu.memory_space<vmem>>, %arg4: memref<64x1xf32, #tpu.memory_space<vmem>>, %arg5: memref<64x1xf32, #tpu.memory_space<vmem>>, %arg6: memref<1x64x1xf32, #tpu.memory_space<vmem>>, %arg7: memref<1x64x1xf32, #tpu.memory_space<vmem>>, %arg8: memref<64x64xf32, #tpu.memory_space<vmem>>, %arg9: memref<64x64xf32, #tpu.memory_space<vmem>>) attributes {dimension_semantics = [#tpu.dimension_semantics<parallel>, #tpu.dimension_semantics<arbitrary>], iteration_bounds = array<i64: 2, 1>, scalar_prefetch = 0 : i64, scratch_operands = 2 : i64, tpu.core_type = #tpu.core_type<tc>, window_params = [{transform_indices = @transform_0, window_bounds = array<i64: 1, 64, 64>}, {pipeline_mode = #tpu.pipeline_mode<synchronous>, transform_indices = @transform_1, window_bounds = array<i64: 64, 64>}, {pipeline_mode = #tpu.pipeline_mode<synchronous>, transform_indices = @transform_2, window_bounds = array<i64: 64, 1>}, {pipeline_mode = #tpu.pipeline_mode<synchronous>, transform_indices = @transform_3, window_bounds = array<i64: 64, 1>}, {transform_indices = @transform_4, window_bounds = array<i64: 1, 64, 1>}, {transform_indices = @transform_5, window_bounds = array<i64: 1, 64, 1>}]} {
    %c0_i32 = arith.constant 0 : i32
    %0 = arith.cmpi eq, %arg1, %c0_i32 : i32
    %1 = arith.extui %0 : i1 to i32
    %c0_i32_0 = arith.constant 0 : i32
    %2 = arith.cmpi ne, %1, %c0_i32_0 : i32
    scf.if %2 {
      %cst = arith.constant 0.000000e+00 : f32
      %15 = vector.broadcast %cst : f32 to vector<64x64xf32>
      %c0_13 = arith.constant 0 : index
      %c0_14 = arith.constant 0 : index
      %16 = vector.load %arg8[%c0_13, %c0_14] : memref<64x64xf32, #tpu.memory_space<vmem>>, vector<64x64xf32>
      tpu.vector_store %arg8[%c0_13, %c0_14], %15 {strides = array<i32>} : memref<64x64xf32, #tpu.memory_space<vmem>>, vector<64x64xf32>,
      %cst_15 = arith.constant 0.000000e+00 : f32
      %17 = vector.broadcast %cst_15 : f32 to vector<64x64xf32>
      %c0_16 = arith.constant 0 : index
      %c0_17 = arith.constant 0 : index
      %18 = vector.load %arg9[%c0_16, %c0_17] : memref<64x64xf32, #tpu.memory_space<vmem>>, vector<64x64xf32>
      tpu.vector_store %arg9[%c0_16, %c0_17], %17 {strides = array<i32>} : memref<64x64xf32, #tpu.memory_space<vmem>>, vector<64x64xf32>,
    } else {
    }
    %c0 = arith.constant 0 : index
    %c0_1 = arith.constant 0 : index
    %3 = vector.load %arg8[%c0, %c0_1] : memref<64x64xf32, #tpu.memory_space<vmem>>, vector<64x64xf32>
    %c0_2 = arith.constant 0 : index
    %c0_3 = arith.constant 0 : index
    %4 = vector.load %arg9[%c0_2, %c0_3] : memref<64x64xf32, #tpu.memory_space<vmem>>, vector<64x64xf32>
    %c0_4 = arith.constant 0 : index
    %c0_5 = arith.constant 0 : index
    %c0_6 = arith.constant 0 : index
    %5 = vector.load %arg2[%c0_4, %c0_5, %c0_6] : memref<1x64x64xf32, #tpu.memory_space<vmem>>, vector<1x64x64xf32>
    %6 = vector.shape_cast %5 : vector<1x64x64xf32> to vector<64x64xf32>
    %7 = arith.addf %3, %6 : vector<64x64xf32>
    %8 = arith.mulf %6, %6 : vector<64x64xf32>
    %9 = arith.addf %4, %8 : vector<64x64xf32>
    %c0_7 = arith.constant 0 : index
    %c0_8 = arith.constant 0 : index
    %10 = vector.load %arg8[%c0_7, %c0_8] : memref<64x64xf32, #tpu.memory_space<vmem>>, vector<64x64xf32>
    tpu.vector_store %arg8[%c0_7, %c0_8], %7 {strides = array<i32>} : memref<64x64xf32, #tpu.memory_space<vmem>>, vector<64x64xf32>,
    %c0_9 = arith.constant 0 : index
    %c0_10 = arith.constant 0 : index
    %11 = vector.load %arg9[%c0_9, %c0_10] : memref<64x64xf32, #tpu.memory_space<vmem>>, vector<64x64xf32>
    tpu.vector_store %arg9[%c0_9, %c0_10], %9 {strides = array<i32>} : memref<64x64xf32, #tpu.memory_space<vmem>>, vector<64x64xf32>,
    %c0_i32_11 = arith.constant 0 : i32
    %12 = arith.cmpi eq, %arg1, %c0_i32_11 : i32
    %13 = arith.extui %12 : i1 to i32
    %c0_i32_12 = arith.constant 0 : i32
    %14 = arith.cmpi ne, %13, %c0_i32_12 : i32
    scf.if %14 {
      %c0_13 = arith.constant 0 : index
      %c0_14 = arith.constant 0 : index
      %15 = vector.load %arg8[%c0_13, %c0_14] : memref<64x64xf32, #tpu.memory_space<vmem>>, vector<64x64xf32>
      %c0_15 = arith.constant 0 : index
      %c0_16 = arith.constant 0 : index
      %16 = vector.load %arg9[%c0_15, %c0_16] : memref<64x64xf32, #tpu.memory_space<vmem>>, vector<64x64xf32>
      %17 = tpu.concatenate %15, %16 in 1 : vector<64x64xf32>, vector<64x64xf32> -> vector<64x128xf32>
      %c0_17 = arith.constant 0 : index
      %c0_18 = arith.constant 0 : index
      %18 = vector.load %arg3[%c0_17, %c0_18] : memref<64x64xf32, #tpu.memory_space<vmem>>, vector<64x64xf32>
      %cst = arith.constant dense<0.000000e+00> : vector<64x128xf32>
      %19 = tpu.matmul %18, %17, %cst {dimension_numbers = #tpu.dot_dimension_numbers<[1], [0], [0], [1], [0, 0, 1, 1], [], []>} : vector<64x64xf32>, vector<64x128xf32>, vector<64x128xf32> -> vector<64x128xf32>
      %20 = vector.extract_strided_slice %19 {offsets = [0, 0], sizes = [64, 64], strides = [1, 1]} : vector<64x128xf32> to vector<64x64xf32>
      %cst_19 = arith.constant dense<0.000000e+00> : vector<64xf32>
      %21 = vector.multi_reduction <add>, %20, %cst_19 [1] : vector<64x64xf32> to vector<64xf32>
      %22 = vector.shape_cast %21 : vector<64xf32> to vector<64x1xf32>
      %23 = vector.extract_strided_slice %19 {offsets = [0, 64], sizes = [64, 64], strides = [1, 1]} : vector<64x128xf32> to vector<64x64xf32>
      %cst_20 = arith.constant dense<0.000000e+00> : vector<64xf32>
      %24 = vector.multi_reduction <add>, %23, %cst_20 [1] : vector<64x64xf32> to vector<64xf32>
      %25 = vector.shape_cast %24 : vector<64xf32> to vector<64x1xf32>
      %cst_21 = arith.constant 7.812500e-03 : f32
      %26 = vector.broadcast %cst_21 : f32 to vector<64x1xf32>
      %27 = arith.mulf %22, %26 : vector<64x1xf32>
      %cst_22 = arith.constant 7.812500e-03 : f32
      %28 = vector.broadcast %cst_22 : f32 to vector<64x1xf32>
      %29 = arith.mulf %25, %28 : vector<64x1xf32>
      %30 = arith.mulf %27, %27 : vector<64x1xf32>
      %31 = arith.subf %29, %30 : vector<64x1xf32>
      %cst_23 = arith.constant 9.99999974E-6 : f32
      %32 = vector.broadcast %cst_23 : f32 to vector<64x1xf32>
      %33 = arith.addf %31, %32 : vector<64x1xf32>
      %34 = math.rsqrt %33 : vector<64x1xf32>
      %c0_24 = arith.constant 0 : index
      %c0_25 = arith.constant 0 : index
      %35 = vector.load %arg4[%c0_24, %c0_25] : memref<64x1xf32, #tpu.memory_space<vmem>>, vector<64x1xf32>
      %36 = arith.mulf %34, %35 : vector<64x1xf32>
      %c0_26 = arith.constant 0 : index
      %c0_27 = arith.constant 0 : index
      %c0_28 = arith.constant 0 : index
      %37 = vector.load %arg6[%c0_26, %c0_27, %c0_28] : memref<1x64x1xf32, #tpu.memory_space<vmem>>, vector<1x64x1xf32>
      %38 = vector.shape_cast %37 : vector<1x64x1xf32> to vector<64x1xf32>
      %39 = vector.shape_cast %36 : vector<64x1xf32> to vector<1x64x1xf32>
      tpu.vector_store %arg6[%c0_26, %c0_27, %c0_28], %39 {strides = array<i32>} : memref<1x64x1xf32, #tpu.memory_space<vmem>>, vector<1x64x1xf32>,
      %c0_29 = arith.constant 0 : index
      %c0_30 = arith.constant 0 : index
      %40 = vector.load %arg5[%c0_29, %c0_30] : memref<64x1xf32, #tpu.memory_space<vmem>>, vector<64x1xf32>
      %41 = arith.mulf %27, %36 : vector<64x1xf32>
      %42 = arith.subf %40, %41 : vector<64x1xf32>
      %c0_31 = arith.constant 0 : index
      %c0_32 = arith.constant 0 : index
      %c0_33 = arith.constant 0 : index
      %43 = vector.load %arg7[%c0_31, %c0_32, %c0_33] : memref<1x64x1xf32, #tpu.memory_space<vmem>>, vector<1x64x1xf32>
      %44 = vector.shape_cast %43 : vector<1x64x1xf32> to vector<64x1xf32>
      %45 = vector.shape_cast %42 : vector<64x1xf32> to vector<1x64x1xf32>
      tpu.vector_store %arg7[%c0_31, %c0_32, %c0_33], %45 {strides = array<i32>} : memref<1x64x1xf32, #tpu.memory_space<vmem>>, vector<1x64x1xf32>,
    } else {
    }
    return
  }
  func.func @transform_0(%arg0: i32, %arg1: i32) -> (i32, i32, i32) {
    %c0_i32 = arith.constant 0 : i32
    %c0_i32_0 = arith.constant 0 : i32
    return %arg0, %c0_i32, %arg1 : i32, i32, i32
  }
  func.func @transform_1(%arg0: i32, %arg1: i32) -> (i32, i32) {
    %c0_i32 = arith.constant 0 : i32
    %c0_i32_0 = arith.constant 0 : i32
    %c0_i32_1 = arith.constant 0 : i32
    return %c0_i32, %c0_i32_0 : i32, i32
  }
  func.func @transform_2(%arg0: i32, %arg1: i32) -> (i32, i32) {
    %c0_i32 = arith.constant 0 : i32
    %c0_i32_0 = arith.constant 0 : i32
    %c0_i32_1 = arith.constant 0 : i32
    return %c0_i32, %c0_i32_0 : i32, i32
  }
  func.func @transform_3(%arg0: i32, %arg1: i32) -> (i32, i32) {
    %c0_i32 = arith.constant 0 : i32
    %c0_i32_0 = arith.constant 0 : i32
    %c0_i32_1 = arith.constant 0 : i32
    return %c0_i32, %c0_i32_0 : i32, i32
  }
  func.func @transform_4(%arg0: i32, %arg1: i32) -> (i32, i32, i32) {
    %c0_i32 = arith.constant 0 : i32
    %c0_i32_0 = arith.constant 0 : i32
    %c0_i32_1 = arith.constant 0 : i32
    return %arg0, %c0_i32, %c0_i32_0 : i32, i32, i32
  }
  func.func @transform_5(%arg0: i32, %arg1: i32) -> (i32, i32, i32) {
    %c0_i32 = arith.constant 0 : i32
    %c0_i32_0 = arith.constant 0 : i32
    %c0_i32_1 = arith.constant 0 : i32
    return %arg0, %c0_i32, %c0_i32_0 : i32, i32, i32
  }
}

</mosaic_0001>

<bundles_post_ra>
// kernel: tpu_custom_call.1
= control target key start
LH: loop header
LB: loop body
LE: loop exit
PB: predicated region body
PF: predicated region fallthrough
CT: control target
= control target key end

     0   :  { %11 = vsyncpa [#allocation5], 0  ;;  %s1118_s18 = smov 0   ;;  %s1120_s19 = smov 0   ;;  %s1414_s0 = inlined_call_operand.vmem [shape: f32[2,64,64], index: 0, kind: input, shape index: {}]   ;;  %s1415_s1 = inlined_call_operand.hbm [shape: f32[64,64], index: 1, kind: input, shape index: {}]   ;;  %s1416_s2 = inlined_call_operand.vmem [shape: f32[64,1], index: 2, kind: input, shape index: {}]   ;;  %s1417_s3 = inlined_call_operand.vmem [shape: f32[64,1], index: 3, kind: input, shape index: {}]   ;;  %s1418_s4 = inlined_call_operand.vmem [shape: f32[2,64,1], index: 4, kind: output, shape index: {0}]   ;;  %s1419_s5 = inlined_call_operand.vmem [shape: f32[2,64,1], index: 5, kind: output, shape index: {1}]  }
   0x1   :  { %s1122_s20 = smov 0  }
   0x2 LB: > { %s858_s21 = sadd.s32 4294967295, %s1081_s20   ;;  %s29_s22 = sadd.s32 1, %s1077_s19  ;;  %s1081_s20 = sphi %s1122_s20, %s17_s20   ;;  %s1077_s19 = sphi %s1120_s19, %s1429_s19   ;;  %s1073_s18 = sphi %s1118_s18, %s1428_s18  }
   0x3   : > { %p31_p0 = scmp.ge.s32.totalorder %s29_s22, 2  ;;  %p860_p1 = scmp.ge.s32.totalorder %s1081_s20, 1 }
   0x4   : > { %p177_p2 = scmp.lt.s32.totalorder %s1081_s20, 3  ;;  %p1143_p4 = scmp.eq.s32.totalorder %s858_s21, 0 }
   0x5   : > { %s1431_s22 = smov (%p31_p0, %s29_s22), 0  ;;  %s1083_s25 = smov [#allocation4]  }
   0x6   : > { %p1139_p3 = pnand %p860_p1, %p177_p2  ;;  %s189_s26 = sshll.u32 %s1083_s25, 4  ;;  %s190_s26 = int_to_ptr.vmem [resolvable:$true] %s189_s26 }
   0x7   : > { %s1424_s24 = scalar_select %p1143_p4, 1, 0 }
   0x8   : > { %s1423_s23 = scalar_select %p1139_p3, 1, 0 }
   0x9   : > { %p956_p5 = pneg %p1139_p3  ;;  %s1027_s30 = scalar_lea.hbm %s1415_s1, 1024 }
   0xa   : > { %p1028_p7 = scmp.ne.s32.totalorder %s1415_s1, %s1027_s30  ;;  %p1034_p11 = scmp.lt.u32.totalorder %s1027_s30, %s1415_s1 }
   0xb   : > { %p1151_p6 = pnand %p1143_p4, %p956_p5 }
   0xd   : > { %p1029_p8 = pneg %p1151_p6 }
   0xf   : > { %p1030_p9 = pnand %p1029_p8, %p1028_p7 }
  0x11   : > { %p1031_p10 = pneg %p1030_p9 }
  0x13   : > { %p1036_p12 = pnand %p1034_p11, %p1031_p10 }
  0x15   : > { %1039 = shalt.err (!%p1036_p12)
}
  0x16   : > { %s1040_s10 = scalar_lea.vmem %s190_s26, 1024  ;;  %p1048_p2 = scmp.lt.s32.totalorder %s190_s26, %s190_s26 }
  0x17   : > { %p1041_p13 = scmp.ne.s32.totalorder %s190_s26, %s1040_s10  ;;  %p1049_p5 = scmp.lt.s32.totalorder %s1040_s10, %s1040_s10 }
  0x19   : > { %p1043_p0 = pnand %p1041_p13, %p1029_p8  ;;  %p1050_p4 = por %p1049_p5, %p1048_p2 }
  0x1b   : > { %p1044_p1 = pneg %p1043_p0 }
  0x1d   : > { %p1051_p3 = pnand %p1050_p4, %p1044_p1 }
  0x1f   : > { %1054 = shalt.err (!%p1051_p3)
}
  0x20   : > { %s1084_s11 = smov 128   ;;  %s1085_s12 = smov 8  }
  0x21   : > { %959 = dma.hbm_to_vmem [thread:$0]  (!%p1151_p6), %s1415_s1, 1024, %s190_s26, [#allocation5], %s1084_s11, %s1084_s11, %s1085_s12  }
  0x22   : > { %p1426_p7 = scmp.ne.s32.totalorder %s1423_s23, 0 }
  0x23   : > { %p1427_p9 = scmp.ne.s32.totalorder (!%p1426_p7), %s1424_s24, 0 }
  0x24   : > { %222 = sbr.rel (%p1426_p7) target bundleno = 709 (0x2c5), region = 36 }
  0x2b   : > { %1068 = dma.done.wait (%p1427_p9), [#allocation5], 1024  }
  0x2c   : > { %1070 = vsyncadd (%p1427_p9), [#allocation5], 4294966272  ;;  %p258_p4 = scmp.lt.s32.totalorder %s1073_s18, 1  ;;  %vm280_vm0 = vcmask 523264   ;;  %v1086_v0 = vmov 0.0   ;;  %v421_v61 = vld [vmem:[#allocation4] sm:$0xff] }
  0x2d   : > { %289 = vst.msk [vmem:[#allocation3] sm:$0xff] %vm280_vm0, %v1086_v0  ;;  %290 = vst.msk [vmem:[#allocation3 + $0x8] sm:$0xff] %vm280_vm0, %v1086_v0  ;;  %916 = vmatprep.mubr.msk.f32.mxu0 %vm280_vm0, %v421_v61  ;;  %v425_v62 = vld [vmem:[#allocation4 + $0x20] sm:$0xff]  ;;  %vm702_vm1 = vcmask 7168  }
  0x2e   : > { %281 = vst.msk [vmem:[#allocation2] sm:$0xff] %vm280_vm0, %v1086_v0  ;;  %282 = vst.msk [vmem:[#allocation2 + $0x8] sm:$0xff] %vm280_vm0, %v1086_v0  ;;  %s1433_s18 = smov (!%p258_p4, %s1073_s18), 1  ;;  %922 = vmatprep.mubr.msk.f32.mxu1 %vm280_vm0, %v425_v62 }
  0x2f   : > { %283 = vst.msk [vmem:[#allocation2 + $0x10] sm:$0xff] %vm280_vm0, %v1086_v0  ;;  %284 = vst.msk [vmem:[#allocation2 + $0x18] sm:$0xff] %vm280_vm0, %v1086_v0  ;;  %s1197_s15 = sshll.u32 %s1433_s18, 6  ;;  %s1087_s18 = smov 64  }
  0x30   : > { %285 = vst.msk [vmem:[#allocation2 + $0x20] sm:$0xff] %vm280_vm0, %v1086_v0  ;;  %286 = vst.msk [vmem:[#allocation2 + $0x28] sm:$0xff] %vm280_vm0, %v1086_v0  ;;  %s1203_s21 = scalar_lea.vmem %s1414_s0, %s1197_s15  ;;  %s1315_s29 = scalar_lea.vmem %s1418_s4, %s1197_s15 }
  0x31   : > { %287 = vst.msk [vmem:[#allocation2 + $0x30] sm:$0xff] %vm280_vm0, %v1086_v0  ;;  %288 = vst.msk [vmem:[#allocation2 + $0x38] sm:$0xff] %vm280_vm0, %v1086_v0  ;;  %v313_v1 = vld [vmem:[%s1203_s21] sm:$0xff]  ;;  %v314_v2 = vld [vmem:[%s1203_s21 + $0x8] sm:$0xff]  ;;  %s1336_s16 = scalar_lea.vmem %s1419_s5, %s1197_s15 }
  0x32   : > { %291 = vst.msk [vmem:[#allocation3 + $0x10] sm:$0xff] %vm280_vm0, %v1086_v0  ;;  %292 = vst.msk [vmem:[#allocation3 + $0x18] sm:$0xff] %vm280_vm0, %v1086_v0  ;;  %v315_v3 = vld [vmem:[%s1203_s21 + $0x10] sm:$0xff]  ;;  %v329_v6 = vmul.f32 %v313_v1, %v313_v1  ;;  %v330_v7 = vmul.f32 %v314_v2, %v314_v2  ;;  %v316_v17 = vld [vmem:[%s1203_s21 + $0x18] sm:$0xff] }
  0x33   : > { %293 = vst.msk [vmem:[#allocation3 + $0x20] sm:$0xff] %vm280_vm0, %v1086_v0  ;;  %294 = vst.msk [vmem:[#allocation3 + $0x28] sm:$0xff] %vm280_vm0, %v1086_v0  ;;  %v331_v9 = vmul.f32 %v315_v3, %v315_v3  ;;  %v332_v21 = vmul.f32 %v316_v17, %v316_v17  ;;  %v317_v22 = vld [vmem:[%s1203_s21 + $0x20] sm:$0xff]  ;;  %v318_v23 = vld [vmem:[%s1203_s21 + $0x28] sm:$0xff] }
  0x34   : > { %295 = vst.msk [vmem:[#allocation3 + $0x30] sm:$0xff] %vm280_vm0, %v1086_v0  ;;  %296 = vst.msk [vmem:[#allocation3 + $0x38] sm:$0xff] %vm280_vm0, %v1086_v0  ;;  %v305_v4 = vld [vmem:[#allocation3] sm:$0xff]  ;;  %v306_v5 = vld [vmem:[#allocation3 + $0x8] sm:$0xff]  ;;  %v333_v25 = vmul.f32 %v317_v22, %v317_v22  ;;  %v334_v26 = vmul.f32 %v318_v23, %v318_v23 }
  0x35   : > { %v297_v8 = vld [vmem:[#allocation2] sm:$0xff]  ;;  %v298_v10 = vld [vmem:[#allocation2 + $0x8] sm:$0xff]  ;;  %v337_v14 = vadd.f32 %v329_v6, %v305_v4  ;;  %v338_v15 = vadd.f32 %v330_v7, %v306_v5  ;;  %v319_v33 = vld [vmem:[%s1203_s21 + $0x30] sm:$0xff] }
  0x36   : > { %v321_v11 = vadd.f32 %v313_v1, %v297_v8  ;;  %v322_v16 = vadd.f32 %v314_v2, %v298_v10  ;;  %v320_v34 = vld [vmem:[%s1203_s21 + $0x38] sm:$0xff]  ;;  %v299_v35 = vld [vmem:[#allocation2 + $0x10] sm:$0xff]  ;;  %v335_v38 = vmul.f32 %v319_v33, %v319_v33 }
  0x37   : > { %v301_v24 = vld [vmem:[#allocation2 + $0x20] sm:$0xff]  ;;  %354 = vst.msk [vmem:[#allocation3] sm:$0xff] %vm280_vm0, %v337_v14  ;;  %355 = vst.msk [vmem:[#allocation3 + $0x8] sm:$0xff] %vm280_vm0, %v338_v15  ;;  %v302_v27 = vld [vmem:[#allocation2 + $0x28] sm:$0xff]  ;;  %v336_v39 = vmul.f32 %v320_v34, %v320_v34  ;;  %v323_v43 = vadd.f32 %v315_v3, %v299_v35 }
  0x38   : > { %346 = vst.msk [vmem:[#allocation2] sm:$0xff] %vm280_vm0, %v321_v11  ;;  %347 = vst.msk [vmem:[#allocation2 + $0x8] sm:$0xff] %vm280_vm0, %v322_v16  ;;  %v325_v28 = vadd.f32 %v317_v22, %v301_v24  ;;  %v326_v32 = vadd.f32 %v318_v23, %v302_v27  ;;  %v300_v40 = vld [vmem:[#allocation2 + $0x18] sm:$0xff]  ;;  %v303_v41 = vld [vmem:[#allocation2 + $0x30] sm:$0xff] }
  0x39   : > { %v307_v12 = vld [vmem:[#allocation3 + $0x10] sm:$0xff]  ;;  %v308_v13 = vld [vmem:[#allocation3 + $0x18] sm:$0xff]  ;;  %v324_v44 = vadd.f32 %v316_v17, %v300_v40  ;;  %v327_v45 = vadd.f32 %v319_v33, %v303_v41  ;;  %348 = vst.msk [vmem:[#allocation2 + $0x10] sm:$0xff] %vm280_vm0, %v323_v43 }
  0x3a   : > { %v339_v18 = vadd.f32 %v331_v9, %v307_v12  ;;  %v309_v19 = vld [vmem:[#allocation3 + $0x20] sm:$0xff]  ;;  %v310_v20 = vld [vmem:[#allocation3 + $0x28] sm:$0xff]  ;;  %v340_v31 = vadd.f32 %v332_v21, %v308_v13  ;;  %350 = vst.msk [vmem:[#allocation2 + $0x20] sm:$0xff] %vm280_vm0, %v325_v28  ;;  %v304_v42 = vld [vmem:[#allocation2 + $0x38] sm:$0xff] }
  0x3b   : > { %v311_v29 = vld [vmem:[#allocation3 + $0x30] sm:$0xff]  ;;  %v312_v30 = vld [vmem:[#allocation3 + $0x38] sm:$0xff]  ;;  %v341_v36 = vadd.f32 %v333_v25, %v309_v19  ;;  %v342_v37 = vadd.f32 %v334_v26, %v310_v20  ;;  %351 = vst.msk [vmem:[#allocation2 + $0x28] sm:$0xff] %vm280_vm0, %v326_v32  ;;  %v328_v46 = vadd.f32 %v320_v34, %v304_v42  ;;  %349 = vst.msk [vmem:[#allocation2 + $0x18] sm:$0xff] %vm280_vm0, %v324_v44 }
  0x3c   : > { %356 = vst.msk [vmem:[#allocation3 + $0x10] sm:$0xff] %vm280_vm0, %v339_v18  ;;  %357 = vst.msk [vmem:[#allocation3 + $0x18] sm:$0xff] %vm280_vm0, %v340_v31  ;;  %v343_v47 = vadd.f32 %v335_v38, %v311_v29  ;;  %v344_v48 = vadd.f32 %v336_v39, %v312_v30  ;;  %v422_v31 = vld [vmem:[#allocation4 + $0x8] sm:$0xff]  ;;  %v423_v33 = vld [vmem:[#allocation4 + $0x10] sm:$0xff] }
  0x3d   : > { %358 = vst.msk [vmem:[#allocation3 + $0x20] sm:$0xff] %vm280_vm0, %v341_v36  ;;  %359 = vst.msk [vmem:[#allocation3 + $0x28] sm:$0xff] %vm280_vm0, %v342_v37  ;;  %v426_v32 = vld [vmem:[#allocation4 + $0x28] sm:$0xff]  ;;  %v427_v34 = vld [vmem:[#allocation4 + $0x30] sm:$0xff] }
  0x3e   : > { %352 = vst.msk [vmem:[#allocation2 + $0x30] sm:$0xff] %vm280_vm0, %v327_v45  ;;  %353 = vst.msk [vmem:[#allocation2 + $0x38] sm:$0xff] %vm280_vm0, %v328_v46  ;;  %v373_v49 = vld [vmem:[#allocation3] sm:$0xff]  ;;  %v374_v50 = vld [vmem:[#allocation3 + $0x8] sm:$0xff] }
  0x3f   : > { %360 = vst.msk [vmem:[#allocation3 + $0x30] sm:$0xff] %vm280_vm0, %v343_v47  ;;  %361 = vst.msk [vmem:[#allocation3 + $0x38] sm:$0xff] %vm280_vm0, %v344_v48  ;;  %v991_v51 = vpack.i.bf16 %v374_v50, %v373_v49  ;;  %v365_v0 = vld [vmem:[#allocation2] sm:$0xff]  ;;  %v366_v1 = vld [vmem:[#allocation2 + $0x8] sm:$0xff] }
  0x40   : > { %v367_v8 = vld [vmem:[#allocation2 + $0x10] sm:$0xff]  ;;  %v424_v35 = vld [vmem:[#allocation4 + $0x18] sm:$0xff] }
  0x41   : > { %992 = vrot.lane.b32.xlu0 %v991_v51, %s1087_s18  ;;  %v369_v11 = vld [vmem:[#allocation2 + $0x20] sm:$0xff]  ;;  %v428_v36 = vld [vmem:[#allocation4 + $0x38] sm:$0xff] }
  0x42   : > { %v368_v9 = vld [vmem:[#allocation2 + $0x18] sm:$0xff]  ;;  %v370_v16 = vld [vmem:[#allocation2 + $0x28] sm:$0xff] }
  0x43   : > { %v375_v52 = vld [vmem:[#allocation3 + $0x10] sm:$0xff]  ;;  %v376_v53 = vld [vmem:[#allocation3 + $0x18] sm:$0xff] }
  0x44   : > { %v996_v54 = vpack.i.bf16 %v376_v53, %v375_v52  ;;  %v377_v55 = vld [vmem:[#allocation3 + $0x20] sm:$0xff]  ;;  %v378_v56 = vld [vmem:[#allocation3 + $0x28] sm:$0xff] }
  0x45   : > { %v1001_v57 = vpack.i.bf16 %v378_v56, %v377_v55  ;;  %v371_v23 = vld [vmem:[#allocation2 + $0x30] sm:$0xff]  ;;  %v372_v24 = vld [vmem:[#allocation2 + $0x38] sm:$0xff] }
  0x46   : > { %v379_v58 = vld [vmem:[#allocation3 + $0x30] sm:$0xff]  ;;  %v380_v59 = vld [vmem:[#allocation3 + $0x38] sm:$0xff]  ;;  %997 = vrot.lane.b32.xlu0 %v996_v54, %s1087_s18 }
  0x47   : > { %1002 = vrot.lane.b32.xlu1 %v1001_v57, %s1087_s18  ;;  %v1006_v60 = vpack.i.bf16 %v380_v59, %v379_v58 }
  0x4b   : > { %1007 = vrot.lane.b32.xlu1 %v1006_v60, %s1087_s18 }
  0xb3   : > { %v993_v63 = vpop.permute.xlu0 %992 }
  0xb4   : > { %v995_v2 = vunpack.i.h.bf16 %v993_v63  ;;  %v994_v3 = vunpack.i.l.bf16 %v993_v63 }
  0xb6   : > { %v413_v4 = vsel %vm280_vm0, %v365_v0, %v994_v3  ;;  %v414_v5 = vsel %vm280_vm0, %v366_v1, %v995_v2 }
  0xb7   : > { %v928_v6 = vpack.c.bf16 %v414_v5, %v413_v4 }
  0xb8   : > { %v998_v7 = vpop.permute.xlu0 %997 }
  0xb9   : > { %v1003_v10 = vpop.permute.xlu1 %1002  ;;  %v1000_v12 = vunpack.i.h.bf16 %v998_v7  ;;  %v999_v13 = vunpack.i.l.bf16 %v998_v7  ;;  %929 = vmatprep.subr.bf16.mxu0 %v928_v6  ;;  %944 = vmatprep.subr.bf16.mxu1 %v928_v6 }
  0xba   : > { %v1005_v14 = vunpack.i.h.bf16 %v1003_v10  ;;  %v1004_v15 = vunpack.i.l.bf16 %v1003_v10  ;;  %931 = vmatpush3.bf16.msra.mxu0 %v928_v6  ;;  %948 = vmatpush3.bf16.msra.mxu1 %v928_v6 }
  0xbb   : > { %v415_v17 = vsel %vm280_vm0, %v367_v8, %v999_v13  ;;  %v416_v18 = vsel %vm280_vm0, %v368_v9, %v1000_v12 }
  0xbc   : > { %v417_v19 = vsel %vm280_vm0, %v369_v11, %v1004_v15  ;;  %v932_v20 = vpack.c.bf16 %v416_v18, %v415_v17  ;;  %v418_v21 = vsel %vm280_vm0, %v370_v16, %v1005_v14 }
  0xbd   : > { %v1008_v22 = vpop.permute.xlu1 %1007  ;;  %v936_v25 = vpack.c.bf16 %v418_v21, %v417_v19 }
  0xbe   : > { %v1010_v26 = vunpack.i.h.bf16 %v1008_v22  ;;  %v1009_v27 = vunpack.i.l.bf16 %v1008_v22  ;;  %933 = vmatprep.subr.bf16.mxu0 %v932_v20  ;;  %945 = vmatprep.subr.bf16.mxu1 %v932_v20 }
  0xbf   : > { %935 = vmatpush3.bf16.msra.mxu0 %v932_v20  ;;  %949 = vmatpush3.bf16.msra.mxu1 %v932_v20 }
  0xc0   : > { %v419_v28 = vsel %vm280_vm0, %v371_v23, %v1009_v27  ;;  %v420_v29 = vsel %vm280_vm0, %v372_v24, %v1010_v26  ;;  %937 = vmatprep.subr.bf16.mxu0 %v936_v25  ;;  %946 = vmatprep.subr.bf16.mxu1 %v936_v25 }
  0xc1   : > { %v940_v30 = vpack.c.bf16 %v420_v29, %v419_v28 }
  0xc3   : > { %939 = vmatpush3.bf16.msra.mxu0 %v936_v25  ;;  %950 = vmatpush3.bf16.msra.mxu1 %v936_v25 }
  0xc4   : > { %941 = vmatprep.subr.bf16.mxu0 %v940_v30  ;;  %947 = vmatprep.subr.bf16.mxu1 %v940_v30 }
  0xc7   : > { %943 = vmatpush3.bf16.msra.mxu0 %v940_v30  ;;  %951 = vmatpush3.bf16.msra.mxu1 %v940_v30 }
  0xca   : > { %917 = vmatmul.mubr.msk.f32.vlgmr.msra.gmra.mrb[0].mxu0 %vm280_vm0, %v422_v31  ;;  %923 = vmatmul.mubr.msk.f32.vlgmr.msra.gmra.mrb[0].mxu1 %vm280_vm0, %v426_v32 }
  0xcb   : > { %919 = vmatprep.mubr.msk.f32.mxu0 %vm280_vm0, %v423_v33  ;;  %925 = vmatprep.mubr.msk.f32.mxu1 %vm280_vm0, %v427_v34 }
  0xce   : > { %920 = vmatmul.mubr.msk.f32.gmra.mrb[2].mxu0 %vm280_vm0, %v424_v35  ;;  %926 = vmatmul.mubr.msk.f32.gmra.mrb[2].mxu1 %vm280_vm0, %v428_v36 }
 0x19d   : > { %v918_v37 = vpop.f32.mrb[0].mxu0  ;;  %v924_v38 = vpop.f32.mrb[0].mxu1 }
 0x19e   : > { %592 = vrot.lane.b32.xlu1 %v918_v37, %s1087_s18  ;;  %v519_v39 = vpop.f32.mrb[1].mxu0  ;;  %v539_v40 = vpop.f32.mrb[1].mxu1  ;;  %v561_v46 = vsel %vm280_vm0, %v918_v37, 0.0  ;;  %v573_v47 = vsel %vm280_vm0, %v924_v38, 0.0 }
 0x19f   : > { %590 = vrot.lane.b32.xlu0 %v519_v39, %s1087_s18  ;;  %v558_v45 = vsel %vm280_vm0, %v519_v39, 0.0  ;;  %v570_v48 = vsel %vm280_vm0, %v539_v40, 0.0 }
 0x1a1   : > { %v921_v41 = vpop.f32.mrb[2].mxu0  ;;  %v927_v42 = vpop.f32.mrb[2].mxu1 }
 0x1a2   : > { %600 = vrot.lane.b32.xlu1 %v924_v38, %s1087_s18  ;;  %v529_v43 = vpop.f32.mrb[3].mxu0  ;;  %v549_v44 = vpop.f32.mrb[3].mxu1  ;;  %v567_v49 = vsel %vm280_vm0, %v921_v41, 0.0  ;;  %v579_v51 = vsel %vm280_vm0, %v927_v42, 0.0 }
 0x1a3   : > { %598 = vrot.lane.b32.xlu0 %v539_v40, %s1087_s18  ;;  %v576_v50 = vsel %vm280_vm0, %v549_v44, 0.0  ;;  %v564_v52 = vsel %vm280_vm0, %v529_v43, 0.0 }
 0x1a6   : > { %596 = vrot.lane.b32.xlu1 %v921_v41, %s1087_s18 }
 0x1a7   : > { %594 = vrot.lane.b32.xlu0 %v529_v43, %s1087_s18 }
 0x1aa   : > { %604 = vrot.lane.b32.xlu1 %v927_v42, %s1087_s18 }
 0x1ab   : > { %602 = vrot.lane.b32.xlu0 %v549_v44, %s1087_s18 }
 0x1ca   : > { %559 = vadd.xlane.f32.xlu0 %v558_v45 }
 0x1ce   : > { %562 = vadd.xlane.f32.xlu1 %v561_v46  ;;  %574 = vadd.xlane.f32.xlu0 %v573_v47 }
 0x1d2   : > { %571 = vadd.xlane.f32.xlu1 %v570_v48  ;;  %568 = vadd.xlane.f32.xlu0 %v567_v49 }
 0x1d6   : > { %577 = vadd.xlane.f32.xlu1 %v576_v50  ;;  %580 = vadd.xlane.f32.xlu0 %v579_v51 }
 0x1da   : > { %565 = vadd.xlane.f32.xlu0 %v564_v52 }
 0x210   : > { %v593_v53 = vpop.permute.xlu1 %592 }
 0x211   : > { %v591_v54 = vpop.permute.xlu0 %590  ;;  %v617_v55 = vsel %vm280_vm0, %v593_v53, 0.0 }
 0x212   : > { %618 = vadd.xlane.f32.xlu0 %v617_v55  ;;  %v614_v56 = vsel %vm280_vm0, %v591_v54, 0.0 }
 0x213   : > { %615 = vadd.xlane.f32.xlu1 %v614_v56 }
 0x214   : > { %v601_v57 = vpop.permute.xlu1 %600 }
 0x215   : > { %v599_v58 = vpop.permute.xlu0 %598  ;;  %v629_v59 = vsel %vm280_vm0, %v601_v57, 0.0  ;;  %v687_v57 = vld [vmem:[%s1416_s2 + $0x8] sm:$0xff] }
 0x216   : > { %630 = vadd.xlane.f32.xlu0 %v629_v59  ;;  %v626_v60 = vsel %vm280_vm0, %v599_v58, 0.0  ;;  %v686_v59 = vld [vmem:[%s1416_s2] sm:$0xff] }
 0x217   : > { %627 = vadd.xlane.f32.xlu1 %v626_v60 }
 0x218   : > { %v597_v61 = vpop.permute.xlu1 %596 }
 0x219   : > { %v595_v62 = vpop.permute.xlu0 %594  ;;  %v623_v63 = vsel %vm280_vm0, %v597_v61, 0.0 }
 0x21a   : > { %624 = vadd.xlane.f32.xlu0 %v623_v63  ;;  %v620_v0 = vsel %vm280_vm0, %v595_v62, 0.0 }
 0x21b   : > { %621 = vadd.xlane.f32.xlu1 %v620_v0 }
 0x21c   : > { %v605_v1 = vpop.permute.xlu1 %604 }
 0x21d   : > { %v603_v2 = vpop.permute.xlu0 %602  ;;  %v635_v3 = vsel %vm280_vm0, %v605_v1, 0.0 }
 0x21e   : > { %636 = vadd.xlane.f32.xlu0 %v635_v3  ;;  %v632_v4 = vsel %vm280_vm0, %v603_v2, 0.0  ;;  %v712_v2 = vld [vmem:[%s1417_s3 + $0x8] sm:$0xff] }
 0x21f   : > { %633 = vadd.xlane.f32.xlu1 %v632_v4  ;;  %v691_v4 = vld [vmem:[%s1416_s2 + $0x28] sm:$0xff] }
 0x257   : > { %v560_v5 = vpop.xlane.xlu0 %559 }
 0x258   : > { %v1275_v14 = vmul.f32 0.0078125, %v560_v5 }
 0x25a   : > { %v654_v20 = vmul.f32 %v1275_v14, %v1275_v14 }
 0x25b   : > { %v575_v6 = vpop.xlane.xlu0 %574  ;;  %v563_v8 = vpop.xlane.xlu1 %562 }
 0x25c   : > { %v1273_v12 = vmul.f32 0.0078125, %v563_v8  ;;  %v1279_v17 = vmul.f32 0.0078125, %v575_v6  ;;  %v711_v6 = vld [vmem:[%s1417_s3] sm:$0xff] }
 0x25e   : > { %v655_v16 = vmul.f32 %v1273_v12, %v1273_v12  ;;  %v659_v26 = vmul.f32 %v1279_v17, %v1279_v17 }
 0x25f   : > { %v569_v7 = vpop.xlane.xlu0 %568  ;;  %v572_v10 = vpop.xlane.xlu1 %571 }
 0x260   : > { %v1283_v21 = vmul.f32 0.0078125, %v572_v10  ;;  %v1287_v27 = vmul.f32 0.0078125, %v569_v7  ;;  %v690_v7 = vld [vmem:[%s1416_s2 + $0x20] sm:$0xff] }
 0x262   : > { %v658_v31 = vmul.f32 %v1283_v21, %v1283_v21  ;;  %v657_v38 = vmul.f32 %v1287_v27, %v1287_v27 }
 0x263   : > { %v581_v9 = vpop.xlane.xlu0 %580  ;;  %v578_v13 = vpop.xlane.xlu1 %577 }
 0x264   : > { %v1295_v39 = vmul.f32 0.0078125, %v581_v9  ;;  %v1297_v43 = vmul.f32 0.0078125, %v578_v13 }
 0x266   : > { %v661_v50 = vmul.f32 %v1295_v39, %v1295_v39  ;;  %v660_v54 = vmul.f32 %v1297_v43, %v1297_v43 }
 0x267   : > { %v566_v11 = vpop.xlane.xlu0 %565 }
 0x268   : > { %v1291_v32 = vmul.f32 0.0078125, %v566_v11 }
 0x26a   : > { %v656_v44 = vmul.f32 %v1291_v32, %v1291_v32 }
 0x29f   : > { %v619_v15 = vpop.xlane.xlu0 %618 }
 0x2a0   : > { %v647_v18 = vmul.f32 0.0078125, %v619_v15  ;;  %v616_v19 = vpop.xlane.xlu1 %615  ;;  %v716_v15 = vld [vmem:[%s1417_s3 + $0x28] sm:$0xff] }
 0x2a1   : > { %v646_v22 = vmul.f32 0.0078125, %v616_v19  ;;  %v715_v19 = vld [vmem:[%s1417_s3 + $0x20] sm:$0xff] }
 0x2a2   : > { %v663_v23 = vsub.f32 %v647_v18, %v655_v16  ;;  %v689_v18 = vld [vmem:[%s1416_s2 + $0x18] sm:$0xff] }
 0x2a3   : > { %v662_v24 = vsub.f32 %v646_v22, %v654_v20  ;;  %v631_v25 = vpop.xlane.xlu0 %630  ;;  %v688_v20 = vld [vmem:[%s1416_s2 + $0x10] sm:$0xff] }
 0x2a4   : > { %v671_v28 = vadd.f32 1e-05, %v663_v23  ;;  %v651_v29 = vmul.f32 0.0078125, %v631_v25  ;;  %v628_v30 = vpop.xlane.xlu1 %627 }
 0x2a5   : > { %v670_v33 = vadd.f32 1e-05, %v662_v24  ;;  %v650_v34 = vmul.f32 0.0078125, %v628_v30  ;;  %v693_v30 = vld [vmem:[%s1416_s2 + $0x38] sm:$0xff] }
 0x2a6   : > { %1011 = vrsqrt.f32 %v671_v28  ;;  %v667_v35 = vsub.f32 %v651_v29, %v659_v26  ;;  %v714_v28 = vld [vmem:[%s1417_s3 + $0x18] sm:$0xff] }
 0x2a7   : > { %1013 = vrsqrt.f32 %v670_v33  ;;  %v666_v36 = vsub.f32 %v650_v34, %v658_v31  ;;  %v625_v37 = vpop.xlane.xlu0 %624  ;;  %v713_v31 = vld [vmem:[%s1417_s3 + $0x10] sm:$0xff] }
 0x2a8   : > { %v675_v40 = vadd.f32 1e-05, %v667_v35  ;;  %v649_v41 = vmul.f32 0.0078125, %v625_v37  ;;  %v622_v42 = vpop.xlane.xlu1 %621  ;;  %v692_v33 = vld [vmem:[%s1416_s2 + $0x30] sm:$0xff] }
 0x2a9   : > { %v674_v45 = vadd.f32 1e-05, %v666_v36  ;;  %v648_v46 = vmul.f32 0.0078125, %v622_v42 }
 0x2aa   : > { %1015 = vrsqrt.f32 %v675_v40  ;;  %v665_v47 = vsub.f32 %v649_v41, %v657_v38  ;;  %v718_v40 = vld [vmem:[%s1417_s3 + $0x38] sm:$0xff] }
 0x2ab   : > { %1017 = vrsqrt.f32 %v674_v45  ;;  %v664_v48 = vsub.f32 %v648_v46, %v656_v44  ;;  %v637_v49 = vpop.xlane.xlu0 %636 }
 0x2ac   : > { %v673_v51 = vadd.f32 1e-05, %v665_v47  ;;  %v653_v52 = vmul.f32 0.0078125, %v637_v49  ;;  %v634_v53 = vpop.xlane.xlu1 %633 }
 0x2ad   : > { %v672_v55 = vadd.f32 1e-05, %v664_v48  ;;  %v652_v56 = vmul.f32 0.0078125, %v634_v53 }
 0x2ae   : > { %1019 = vrsqrt.f32 %v673_v51  ;;  %v669_v58 = vsub.f32 %v653_v52, %v661_v50 }
 0x2af   : > { %1021 = vrsqrt.f32 %v672_v55  ;;  %v668_v60 = vsub.f32 %v652_v56, %v660_v54 }
 0x2b0   : > { %v1012_v61 = vpop.eup %1011  ;;  %v677_v62 = vadd.f32 1e-05, %v669_v58 }
 0x2b1   : > { %v1014_v63 = vpop.eup %1013  ;;  %v695_v0 = vmul.f32 %v1012_v61, %v687_v57  ;;  %v676_v1 = vadd.f32 1e-05, %v668_v60 }
 0x2b2   : > { %v694_v3 = vmul.f32 %v1014_v63, %v686_v59  ;;  %1023 = vrsqrt.f32 %v677_v62 }
 0x2b3   : > { %704 = vst.msk [vmem:[%s1315_s29 + $0x8] sm:$0xff] %vm702_vm1, %v695_v0  ;;  %v720_v5 = vmul.f32 %v695_v0, %v1273_v12  ;;  %1025 = vrsqrt.f32 %v676_v1 }
 0x2b4   : > { %v1016_v8 = vpop.eup %1015  ;;  %703 = vst.msk [vmem:[%s1315_s29] sm:$0xff] %vm702_vm1, %v694_v3  ;;  %v719_v9 = vmul.f32 %v694_v3, %v1275_v14 }
 0x2b5   : > { %v1018_v10 = vpop.eup %1017  ;;  %v728_v11 = vsub.f32 %v712_v2, %v720_v5  ;;  %v699_v12 = vmul.f32 %v1016_v8, %v691_v4 }
 0x2b6   : > { %v727_v13 = vsub.f32 %v711_v6, %v719_v9  ;;  %v698_v16 = vmul.f32 %v1018_v10, %v690_v7 }
 0x2b7   : > { %736 = vst.msk [vmem:[%s1336_s16 + $0x8] sm:$0xff] %vm702_vm1, %v728_v11  ;;  %708 = vst.msk [vmem:[%s1315_s29 + $0x28] sm:$0xff] %vm702_vm1, %v699_v12  ;;  %v724_v14 = vmul.f32 %v699_v12, %v1279_v17 }
 0x2b8   : > { %v1020_v22 = vpop.eup %1019  ;;  %735 = vst.msk [vmem:[%s1336_s16] sm:$0xff] %vm702_vm1, %v727_v13  ;;  %707 = vst.msk [vmem:[%s1315_s29 + $0x20] sm:$0xff] %vm702_vm1, %v698_v16  ;;  %v723_v23 = vmul.f32 %v698_v16, %v1283_v21 }
 0x2b9   : > { %v1022_v24 = vpop.eup %1021  ;;  %v732_v25 = vsub.f32 %v716_v15, %v724_v14  ;;  %v697_v17 = vmul.f32 %v1020_v22, %v689_v18 }
 0x2ba   : > { %v731_v26 = vsub.f32 %v715_v19, %v723_v23  ;;  %v696_v29 = vmul.f32 %v1022_v24, %v688_v20 }
 0x2bb   : > { %740 = vst.msk [vmem:[%s1336_s16 + $0x28] sm:$0xff] %vm702_vm1, %v732_v25  ;;  %706 = vst.msk [vmem:[%s1315_s29 + $0x18] sm:$0xff] %vm702_vm1, %v697_v17  ;;  %v722_v21 = vmul.f32 %v697_v17, %v1287_v27 }
 0x2bc   : > { %v1024_v34 = vpop.eup %1023  ;;  %739 = vst.msk [vmem:[%s1336_s16 + $0x20] sm:$0xff] %vm702_vm1, %v731_v26  ;;  %705 = vst.msk [vmem:[%s1315_s29 + $0x10] sm:$0xff] %vm702_vm1, %v696_v29  ;;  %v721_v35 = vmul.f32 %v696_v29, %v1291_v32  ;;  %v717_v32 = vld [vmem:[%s1417_s3 + $0x30] sm:$0xff] }
 0x2bd   : > { %v1026_v36 = vpop.eup %1025  ;;  %v730_v27 = vsub.f32 %v714_v28, %v722_v21  ;;  %v701_v37 = vmul.f32 %v1024_v34, %v693_v30 }
 0x2be   : > { %v729_v38 = vsub.f32 %v713_v31, %v721_v35  ;;  %v700_v41 = vmul.f32 %v1026_v36, %v692_v33 }
 0x2bf   : > { %738 = vst.msk [vmem:[%s1336_s16 + $0x18] sm:$0xff] %vm702_vm1, %v730_v27  ;;  %710 = vst.msk [vmem:[%s1315_s29 + $0x38] sm:$0xff] %vm702_vm1, %v701_v37  ;;  %v726_v42 = vmul.f32 %v701_v37, %v1295_v39 }
 0x2c0   : > { %737 = vst.msk [vmem:[%s1336_s16 + $0x10] sm:$0xff] %vm702_vm1, %v729_v38  ;;  %709 = vst.msk [vmem:[%s1315_s29 + $0x30] sm:$0xff] %vm702_vm1, %v700_v41  ;;  %v725_v44 = vmul.f32 %v700_v41, %v1297_v43 }
 0x2c1   : > { %v734_v45 = vsub.f32 %v718_v40, %v726_v42 }
 0x2c2   : > { %v733_v46 = vsub.f32 %v717_v32, %v725_v44 }
 0x2c3   : > { %742 = vst.msk [vmem:[%s1336_s16 + $0x38] sm:$0xff] %vm702_vm1, %v734_v45 }
 0x2c4   : > { %741 = vst.msk [vmem:[%s1336_s16 + $0x30] sm:$0xff] %vm702_vm1, %v733_v46 }
 0x2c5 PF: > { %s17_s20 = sadd.s32 1, %s1081_s20   ;;  %s1428_s18 = smov %s1077_s19 }
 0x2c6   : > { %p14_p3 = scmp.ge.s32.totalorder %s17_s20, 4   ;;  %s1429_s19 = smov %s1431_s22 }
 0x2c8   :  { %16 = sbr.rel (!%p14_p3) target bundleno = 2 (0x2), region = 91 }
 0x2cf   :  { %780 = vsyncpa [#allocation5], 1 }
 0x2d0   :  { %782 = vsyncpa [#allocation5 + $0x1], 1 }

</bundles_post_ra>
